<compile_context>
chip_gen: v5e
topology: v5e:2x2
jax: 0.10.0
libtpu: 0.0.40
codegen_flags: <defaults>
</compile_context>

<pallas_src>
import jax
import jax.numpy as jnp
from jax.experimental import pallas as pl
from jax.experimental.pallas import tpu as pltpu


def se_block_kernel(x_ref, w1t_ref, w2t_ref, o_ref):
    hw = x_ref.shape[-1]

    # Squeeze: global average pool over the spatial (lane) axis with an f32
    # accumulator; the hot tile itself is never upcast.
    pooled = jnp.sum(x_ref[...], axis=-1, dtype=jnp.float32) * (1.0 / hw)

    # Excitation: (Bt,C)@(C,Cr) -> ReLU -> (Bt,Cr)@(Cr,C) -> sigmoid, all f32.
    z = jnp.dot(pooled, w1t_ref[...], preferred_element_type=jnp.float32)
    z = jnp.maximum(z, 0.0)
    s = jnp.dot(z, w2t_ref[...], preferred_element_type=jnp.float32)
    s = jax.nn.sigmoid(s)

    # Scale: re-read the resident VMEM block rather than keeping the whole
    # multi-MiB tile live across the excitation stage; cast only the tiny gate.
    o_ref[...] = x_ref[...] * s.astype(o_ref.dtype)[:, :, None]


def _padded_per_image_bytes(c, hw, itemsize):
    """VMEM footprint of one image's (C, HW) slab after (sublane, 128) tiling."""
    sublane = max(8, 32 // max(int(itemsize), 1))     # 8 for f32, 16 bf16, 32 int8/fp8
    c_pad = pl.cdiv(c, sublane) * sublane
    hw_pad = pl.cdiv(hw, 128) * 128
    return c_pad * hw_pad * itemsize


def _pick_batch_tile(batch, c, hw, itemsize,
                     target_block_bytes=8 * 1024 * 1024):
    """Batch tile whose padded block is ~target size, with >= 4 grid steps
    (>= 2 per v7x TensorCore) when the batch allows."""
    per_image = _padded_per_image_bytes(c, hw, itemsize)
    max_bt = max(1, int(target_block_bytes // per_image))
    bt = min(batch, max_bt)
    if batch >= 4:
        bt = min(bt, pl.cdiv(batch, 4))
    elif batch >= 2:
        bt = min(bt, pl.cdiv(batch, 2))
    return int(max(1, bt))


def _vmem_limit_bytes(block_bytes, weight_bytes):
    """Padding-aware, generation-aware scoped-VMEM limit for this call."""
    # Pallas double-buffers the input AND output block => ~4 blocks live, plus
    # double-buffered (tiny) weights, plus margin for compiler scratch.
    needed = 4 * block_bytes + 4 * weight_bytes + (4 << 20)
    try:
        cap = int(pltpu.get_tpu_info().vmem_capacity_bytes) - (8 << 20)
    except Exception:
        cap = (64 << 20) - (8 << 20)   # v7x has the smallest physical VMEM (64 MiB)
    return int(min(max(needed, 16 << 20), max(cap, 16 << 20)))


def se_block(x, w1, w2):
    """x: (B, C, H, W). w1: (C//r, C) fc1 weight, w2: (C, C//r) fc2 weight
    (PyTorch nn.Linear (out_features, in_features) layout, no bias)."""
    B, C, H, W = x.shape
    HW = H * W
    Cr = w1.shape[0]
    x_flat = x.reshape(B, C, HW)

    # Pre-transpose weights so in-kernel matmuls have features on lanes.
    w1t = w1.T    # (C, Cr)
    w2t = w2.T    # (Cr, C)

    itemsize = x.dtype.itemsize
    Bt = _pick_batch_tile(B, C, HW, itemsize)
    num_steps = pl.cdiv(B, Bt)                       # ragged last block allowed
    block_bytes = Bt * _padded_per_image_bytes(C, HW, itemsize)
    weight_bytes = _padded_per_image_bytes(C, Cr, 4) + _padded_per_image_bytes(Cr, C, 4)

    cost = pl.CostEstimate(
        flops=2 * B * C * HW + 4 * B * C * Cr,
        transcendentals=B * C,
        bytes_accessed=2 * B * C * HW * itemsize + (w1.size + w2.size) * w1.dtype.itemsize,
    )

    out_flat = pl.pallas_call(
        se_block_kernel,
        out_shape=jax.ShapeDtypeStruct((B, C, HW), x.dtype),
        grid_spec=pltpu.PrefetchScalarGridSpec(
            num_scalar_prefetch=0,
            grid=(num_steps,),
            in_specs=[
                pl.BlockSpec((Bt, C, HW), lambda b: (b, 0, 0)),
                pl.BlockSpec(w1t.shape, lambda b: (0, 0)),
                pl.BlockSpec(w2t.shape, lambda b: (0, 0)),
            ],
            out_specs=pl.BlockSpec((Bt, C, HW), lambda b: (b, 0, 0)),
        ),
        compiler_params=pltpu.CompilerParams(
            dimension_semantics=("parallel",),
            vmem_limit_bytes=_vmem_limit_bytes(block_bytes, weight_bytes),
        ),
        cost_estimate=cost,
    )(x_flat, w1t, w2t)

    return out_flat.reshape(B, C, H, W)


def se_block_ref(x, w1, w2):
    # Pure-JAX reference mirroring the PyTorch forward.
    pooled = jnp.mean(x, axis=(2, 3))          # (B, C)
    z = jnp.maximum(pooled @ w1.T, 0.0)        # (B, C//r)
    s = jax.nn.sigmoid(z @ w2.T)               # (B, C)
    return x * s[:, :, None, None]


if __name__ == "__main__":
    B, C, H, W = 4, 32, 16, 16
    ratio = 4
    Cr = C // ratio

    key = jax.random.PRNGKey(0)
    kx, k1, k2 = jax.random.split(key, 3)

    x = jax.random.uniform(kx, (B, C, H, W), dtype=jnp.float32)
    # Deterministic "Linear" weights (PyTorch layout: (out_features, in_features)).
    w1 = jax.random.normal(k1, (Cr, C), dtype=jnp.float32) * 0.1   # fc1 weight
    w2 = jax.random.normal(k2, (C, Cr), dtype=jnp.float32) * 0.1   # fc2 weight

    out = jax.block_until_ready(se_block(x, w1, w2))
    ref = se_block_ref(x, w1, w2)

    assert out.shape == (B, C, H, W)
    assert jnp.allclose(out, ref, atol=1e-5, rtol=1e-5)

    print("KERNEL_OK")
</pallas_src>

<mosaic_0001>
module attributes {stable_mosaic.version = 11 : i64} {
  func.func @se_block_kernel(%arg0: i32, %arg1: memref<1x32x256xf32, #tpu.memory_space<vmem>>, %arg2: memref<32x8xf32, #tpu.memory_space<vmem>>, %arg3: memref<8x32xf32, #tpu.memory_space<vmem>>, %arg4: memref<1x32x256xf32, #tpu.memory_space<vmem>>) attributes {dimension_semantics = [#tpu.dimension_semantics<parallel>], iteration_bounds = array<i64: 4>, scalar_prefetch = 0 : i64, scratch_operands = 0 : i64, tpu.core_type = #tpu.core_type<tc>, window_params = [{transform_indices = @transform_0, window_bounds = array<i64: 1, 32, 256>}, {pipeline_mode = #tpu.pipeline_mode<synchronous>, transform_indices = @transform_1, window_bounds = array<i64: 32, 8>}, {pipeline_mode = #tpu.pipeline_mode<synchronous>, transform_indices = @transform_2, window_bounds = array<i64: 8, 32>}, {transform_indices = @transform_3, window_bounds = array<i64: 1, 32, 256>}]} {
    %c0 = arith.constant 0 : index
    %c0_0 = arith.constant 0 : index
    %c0_1 = arith.constant 0 : index
    %0 = vector.load %arg1[%c0, %c0_0, %c0_1] : memref<1x32x256xf32, #tpu.memory_space<vmem>>, vector<1x32x256xf32>
    %cst = arith.constant dense<0.000000e+00> : vector<1x32xf32>
    %1 = vector.multi_reduction <add>, %0, %cst [2] : vector<1x32x256xf32> to vector<1x32xf32>
    %cst_2 = arith.constant 3.906250e-03 : f32
    %2 = vector.broadcast %cst_2 : f32 to vector<1x32xf32>
    %3 = arith.mulf %1, %2 : vector<1x32xf32>
    %c0_3 = arith.constant 0 : index
    %c0_4 = arith.constant 0 : index
    %4 = vector.load %arg2[%c0_3, %c0_4] : memref<32x8xf32, #tpu.memory_space<vmem>>, vector<32x8xf32>
    %cst_5 = arith.constant dense<0.000000e+00> : vector<1x8xf32>
    %5 = tpu.matmul %3, %4, %cst_5 {dimension_numbers = #tpu.dot_dimension_numbers<[1], [0], [0], [1], [0, 0, 1, 1], [], []>} : vector<1x32xf32>, vector<32x8xf32>, vector<1x8xf32> -> vector<1x8xf32>
    %cst_6 = arith.constant 0.000000e+00 : f32
    %6 = vector.broadcast %cst_6 : f32 to vector<1x8xf32>
    %7 = arith.maximumf %5, %6 : vector<1x8xf32>
    %c0_7 = arith.constant 0 : index
    %c0_8 = arith.constant 0 : index
    %8 = vector.load %arg3[%c0_7, %c0_8] : memref<8x32xf32, #tpu.memory_space<vmem>>, vector<8x32xf32>
    %cst_9 = arith.constant dense<0.000000e+00> : vector<1x32xf32>
    %9 = tpu.matmul %7, %8, %cst_9 {dimension_numbers = #tpu.dot_dimension_numbers<[1], [0], [0], [1], [0, 0, 1, 1], [], []>} : vector<1x8xf32>, vector<8x32xf32>, vector<1x32xf32> -> vector<1x32xf32>
    %10 = arith.negf %9 : vector<1x32xf32>
    %11 = math.exp %10 : vector<1x32xf32>
    %cst_10 = arith.constant 1.000000e+00 : f32
    %12 = vector.broadcast %cst_10 : f32 to vector<1x32xf32>
    %13 = arith.addf %12, %11 : vector<1x32xf32>
    %14 = arith.divf %12, %13 : vector<1x32xf32>
    %c0_11 = arith.constant 0 : index
    %c0_12 = arith.constant 0 : index
    %c0_13 = arith.constant 0 : index
    %15 = vector.load %arg1[%c0_11, %c0_12, %c0_13] : memref<1x32x256xf32, #tpu.memory_space<vmem>>, vector<1x32x256xf32>
    %16 = vector.shape_cast %14 : vector<1x32xf32> to vector<1x32x1xf32>
    %17 = vector.broadcast %16 : vector<1x32x1xf32> to vector<1x32x256xf32>
    %18 = arith.mulf %15, %17 : vector<1x32x256xf32>
    %c0_14 = arith.constant 0 : index
    %c0_15 = arith.constant 0 : index
    %c0_16 = arith.constant 0 : index
    %19 = vector.load %arg4[%c0_14, %c0_15, %c0_16] : memref<1x32x256xf32, #tpu.memory_space<vmem>>, vector<1x32x256xf32>
    tpu.vector_store %arg4[%c0_14, %c0_15, %c0_16], %18 {strides = array<i32>} : memref<1x32x256xf32, #tpu.memory_space<vmem>>, vector<1x32x256xf32>,
    return
  }
  func.func @transform_0(%arg0: i32) -> (i32, i32, i32) {
    %c0_i32 = arith.constant 0 : i32
    %c0_i32_0 = arith.constant 0 : i32
    %c0_i32_1 = arith.constant 0 : i32
    return %arg0, %c0_i32, %c0_i32_0 : i32, i32, i32
  }
  func.func @transform_1(%arg0: i32) -> (i32, i32) {
    %c0_i32 = arith.constant 0 : i32
    %c0_i32_0 = arith.constant 0 : i32
    %c0_i32_1 = arith.constant 0 : i32
    return %c0_i32, %c0_i32_0 : i32, i32
  }
  func.func @transform_2(%arg0: i32) -> (i32, i32) {
    %c0_i32 = arith.constant 0 : i32
    %c0_i32_0 = arith.constant 0 : i32
    %c0_i32_1 = arith.constant 0 : i32
    return %c0_i32, %c0_i32_0 : i32, i32
  }
  func.func @transform_3(%arg0: i32) -> (i32, i32, i32) {
    %c0_i32 = arith.constant 0 : i32
    %c0_i32_0 = arith.constant 0 : i32
    %c0_i32_1 = arith.constant 0 : i32
    return %arg0, %c0_i32, %c0_i32_0 : i32, i32, i32
  }
}

</mosaic_0001>

<bundles_post_ra>
// kernel: tpu_custom_call.1
= control target key start
LH: loop header
LB: loop body
LE: loop exit
PB: predicated region body
PF: predicated region fallthrough
CT: control target
= control target key end

     0   :  { %8 = vsyncpa [#allocation3], 0  ;;  %s812_s0 = inlined_call_operand.hbm [shape: f32[4,32,256], index: 0, kind: input, shape index: {}]   ;;  %s813_s1 = inlined_call_operand.vmem [shape: f32[32,8], index: 1, kind: input, shape index: {}]   ;;  %s814_s2 = inlined_call_operand.vmem [shape: f32[8,32], index: 2, kind: input, shape index: {}]   ;;  %s815_s3 = inlined_call_operand.hbm [shape: f32[4,32,256], index: 3, kind: output, shape index: {}]  }
   0x1   :  { %10 = vsyncpa [#allocation3 + $0x1], 0 }
   0x2   :  { %11 = vsyncpa [#allocation4], 0 }
   0x3   :  { %13 = vsyncpa [#allocation4 + $0x1], 0  ;;  %s636_s12 = smov 0   ;;  %s638_s13 = smov 0  }
   0x4   :  { %s640_s14 = smov 0   ;;  %s642_s15 = smov 0  }
   0x5 LB: > { %s657_s16 = sadd.s32 4294967295, %s610_s15   ;;  %s436_s17 = sadd.s32 4294967294, %s610_s15   ;;  %s610_s15 = sphi %s642_s15, %s824_s15   ;;  %s606_s14 = sphi %s640_s14, %s823_s14   ;;  %s602_s13 = sphi %s638_s13, %s822_s13   ;;  %s598_s12 = sphi %s636_s12, %s821_s12  }
   0x6   : > { %s661_s18 = sadd.s32 1, %s610_s15   ;;  %s26_s19 = sadd.s32 1, %s606_s14 }
   0x7   : > { %s23_s20 = ssub.s32 %s610_s15, %s661_s18  ;;  %p33_p0 = scmp.ne.s32.totalorder %s606_s14, %s602_s13 }
   0x8   : > { %p24_p1 = scmp.eq.s32.totalorder %s23_s20, 0  ;;  %p34_p2 = scmp.eq.s32.totalorder %s610_s15, 0 }
   0x9   : > { %p39_p3 = scmp.ne.s32.totalorder %s602_s13, %s598_s12  ;;  %p40_p4 = scmp.eq.s32.totalorder %s657_s16, 0 }
   0xa   : > { %s673_s21 = scalar_select %p24_p1, %s606_s14, %s26_s19  }
   0xb   : > { %p675_p5 = por %p34_p2, %p33_p0  ;;  %p679_p6 = por %p40_p4, %p39_p3 }
   0xc   : > { %p105_p7 = scmp.eq.s32.totalorder %s657_s16, 3  ;;  %p111_p8 = scmp.eq.s32.totalorder %s436_s17, 3 }
   0xd   : > { %p467_p9 = scmp.lt.s32.totalorder %s610_s15, 4  ;;  %s137_s26 = sand.u32 1, %s606_s14  }
   0xe   : > { %p685_p10 = por %p105_p7, %p33_p0  ;;  %p689_p11 = por %p111_p8, %p39_p3 }
   0xf   : > { %s453_s27 = sshll.u32 %s610_s15, 6  ;;  %s439_s28 = sshll.u32 %s137_s26, 6 }
  0x10   : > { %s146_s4 = scalar_lea.hbm %s812_s0, %s453_s27  ;;  %s141_s6 = scalar_lea.vmem [#allocation2], %s439_s28 }
  0x11   : > { %s147_s5 = sshll.u32 %s146_s4, 4  ;;  %s149_s7 = sshll.u32 %s141_s6, 4  ;;  %s148_s5 = int_to_ptr.hbm [resolvable:$true] %s147_s5  ;;  %s150_s7 = int_to_ptr.vmem [resolvable:$true] %s149_s7 }
  0x12   : > { %p700_p12 = pnand %p467_p9, %p675_p5  ;;  %p442_p13 = scmp.ge.s32.totalorder %s610_s15, 1 }
  0x13   : > { %p157_p0 = scmp.lt.s32.totalorder %s610_s15, 5  ;;  %s138_s9 = scalar_lea.sflag [#allocation3], %s137_s26 }
  0x14   : > { %s514_s10 = sshra.s32 %s148_s5, 4  ;;  %p518_p2 = pneg %p700_p12  ;;  %s515_s10 = int_to_ptr.hbm [resolvable:$true] %s514_s10 }
  0x15   : > { %s516_s11 = scalar_lea.hbm %s515_s10, 64  ;;  %s521_s20 = scalar_lea.hbm %s812_s0, 256 }
  0x16   : > { %p517_p1 = scmp.ne.s32.totalorder %s515_s10, %s516_s11  ;;  %p522_p5 = scmp.lt.s32.totalorder %s515_s10, %s812_s0 }
  0x17   : > { %p523_p7 = scmp.lt.s32.totalorder %s521_s20, %s516_s11 }
  0x18   : > { %p519_p3 = pnand %p518_p2, %p517_p1 }
  0x19   : > { %p524_p8 = por %p523_p7, %p522_p5 }
  0x1a   : > { %p520_p4 = pneg %p519_p3 }
  0x1c   : > { %p525_p9 = pnand %p524_p8, %p520_p4 }
  0x1e   : > { %528 = shalt.err (!%p525_p9)
}
  0x1f   : > { %s612_s26 = smov 256   ;;  %s613_s28 = smov 16  }
  0x20   : > { %462 = dma.hbm_to_vmem [thread:$0]  (!%p700_p12), %s148_s5, 1024, %s150_s7, %s138_s9, %s612_s26, %s612_s26, %s613_s28  }
  0x21   : > { %p158_p1 = pnand %p442_p13, %p157_p0 }
  0x22   : > { %s721_s29 = sand.u32 (!%p158_p1), 1, %s602_s13  }
  0x23   : > { %161 = sbr.rel (%p158_p1) target bundleno = 583 (0x247), region = 32  ;;  %s443_s30 = sshll.u32 (!%p158_p1), %s721_s29, 6 }
  0x24   : > { %s164_s4 = scalar_lea.sflag (!%p158_p1), [#allocation3], %s721_s29  ;;  %s167_s6 = scalar_lea.vmem (!%p158_p1), [#allocation2], %s443_s30 }
  0x28   : > { %589 = dma.done.wait (%p679_p6), %s164_s4, 1024  }
  0x29   : > { %591 = vsyncadd (%p679_p6), %s164_s4, 4294966272  ;;  %v731_v0 = vld [vmem:[%s167_s6] sm:$0xff]  ;;  %v733_v1 = vld [vmem:[%s167_s6 + $0x8] sm:$0xff]  ;;  %v223_v16 = vlaneseq  ;;  %vm228_vm0 = vcmask 130112   ;;  %vm232_vm1 = vcmask 195712   ;;  %vm236_vm2 = vcmask 261312  }
  0x2a   : > { %v735_v2 = vld [vmem:[%s167_s6 + $0x20] sm:$0xff]  ;;  %v199_v3 = vadd.f32 %v733_v1, %v731_v0  ;;  %v739_v4 = vld [vmem:[%s167_s6 + $0x28] sm:$0xff]  ;;  %v743_v6 = vld [vmem:[%s167_s6 + $0x10] sm:$0xff]  ;;  %vm238_vm3 = vcmask 261120   ;;  %vm263_vm4 = vcmask 64512   ;;  %s190_s22 = scalar_lea.vmem [#allocation5], %s443_s30 }
  0x2b   : > { %v205_v5 = vadd.f32 %v739_v4, %v735_v2  ;;  %v745_v7 = vld [vmem:[%s167_s6 + $0x18] sm:$0xff]  ;;  %v747_v8 = vld [vmem:[%s167_s6 + $0x30] sm:$0xff]  ;;  %v216_v14 = vld [vmem:[%s813_s1 + $0x8] sm:$0xff]  ;;  %v224_v19 = vand.u32 127, %v223_v16  ;;  %v308_v39 = vshrl.u32 %v223_v16, 7  ;;  %s454_s27 = sshll.u32 %s657_s16, 6 }
  0x2c   : > { %200 = vadd.xlane.f32.xlu0 %v199_v3  ;;  %v749_v9 = vld [vmem:[%s167_s6 + $0x38] sm:$0xff]  ;;  %v202_v10 = vadd.f32 %v745_v7, %v743_v6  ;;  %v217_v13 = vld [vmem:[%s813_s1 + $0x10] sm:$0xff]  ;;  %v215_v15 = vld [vmem:[%s813_s1] sm:$0xff]  ;;  %s359_s4 = scalar_lea.hbm %s815_s3, %s454_s27  ;;  %s360_s6 = sshll.u32 %s190_s22, 4  ;;  %s361_s6 = int_to_ptr.vmem [resolvable:$true] %s360_s6 }
  0x2d   : > { %206 = vadd.xlane.f32.xlu1 %v205_v5  ;;  %v208_v11 = vadd.f32 %v749_v9, %v747_v8  ;;  %v218_v12 = vld [vmem:[%s813_s1 + $0x18] sm:$0xff]  ;;  %v226_v21 = vadd.s32 4294967288, %v224_v19  ;;  %v230_v22 = vadd.s32 4294967280, %v224_v19  ;;  %v234_v25 = vadd.s32 4294967272, %v224_v19  ;;  %v262_v36 = vld [vmem:[%s814_s2] sm:$0xff]  ;;  %505 = vset.pattern.permute.xlu2 %v308_v39  ;;  %s362_s23 = sshll.u32 %s359_s4, 4  ;;  %s363_s23 = int_to_ptr.hbm [resolvable:$true] %s362_s23 }
  0x2e   : > { %253 = vmatpush.msra.mxu0 %v218_v12  ;;  %282 = vmatpush.msra.mxu1 %v262_v36  ;;  %v327_v40 = vadd.s32 24, %v308_v39  ;;  %v321_v41 = vadd.s32 16, %v308_v39  ;;  %v315_v57 = vadd.s32 8, %v308_v39  ;;  %s348_s16 = scalar_lea.sflag [#allocation4], %s721_s29  ;;  %s558_s30 = sshra.s32 %s363_s23, 4  ;;  %s559_s30 = int_to_ptr.hbm [resolvable:$true] %s558_s30 }
  0x2f   : > { %s560_s5 = scalar_lea.hbm %s559_s30, 64  ;;  %s564_s9 = scalar_lea.hbm %s815_s3, 256 }
  0x30   : > { %254 = vmatpush.msra.mxu0 %v217_v13  ;;  %508 = vset.pattern.permute.xlu1 %v327_v40  ;;  %p561_p6 = scmp.ne.s32.totalorder %s559_s30, %s560_s5  ;;  %p565_p0 = scmp.lt.s32.totalorder %s559_s30, %s815_s3 }
  0x31   : > { %507 = vset.pattern.permute.xlu0 %v321_v41  ;;  %p566_p2 = scmp.lt.s32.totalorder %s564_s9, %s560_s5 }
  0x32   : > { %255 = vmatpush.msra.mxu0 %v216_v14  ;;  %p562_p12 = pnand %p561_p6, %p685_p10 }
  0x33   : > { %p567_p3 = por %p566_p2, %p565_p0 }
  0x34   : > { %203 = vadd.xlane.f32.xlu0 %v202_v10  ;;  %256 = vmatpush.msra.mxu0 %v215_v15  ;;  %p563_p13 = pneg %p562_p12 }
  0x35   : > { %209 = vadd.xlane.f32.xlu1 %v208_v11 }
  0x36   : > { %p568_p4 = pnand %p567_p3, %p563_p13 }
  0x9f   : > { %v201_v17 = vpop.xlane.xlu0 %200 }
  0xa0   : > { %v207_v18 = vpop.xlane.xlu1 %206  ;;  %v211_v20 = vmul.f32 0.00390625, %v201_v17 }
  0xa1   : > { %v213_v23 = vmul.f32 0.00390625, %v207_v18 }
  0xa2   : > { %v225_v29 = vperm.slane %v211_v20, %v224_v19 }
  0xa3   : > { %v231_v31 = vperm.slane %v213_v23, %v230_v22 }
  0xa7   : > { %v204_v24 = vpop.xlane.xlu0 %203 }
  0xa8   : > { %v212_v26 = vmul.f32 0.00390625, %v204_v24  ;;  %v210_v27 = vpop.xlane.xlu1 %209 }
  0xa9   : > { %v214_v28 = vmul.f32 0.00390625, %v210_v27 }
  0xaa   : > { %v227_v30 = vperm.slane %v212_v26, %v226_v21 }
  0xab   : > { %v235_v32 = vperm.slane %v214_v28, %v234_v25 }
  0xac   : > { %v229_v33 = vsel %vm228_vm0, %v227_v30, %v225_v29 }
  0xad   : > { %v233_v34 = vsel %vm232_vm1, %v231_v31, %v229_v33 }
  0xae   : > { %v237_v35 = vsel %vm236_vm2, %v235_v32, %v233_v34 }
  0xaf   : > { %445 = vmatmul.msk.f32.vlgmr.msra.gmra.mxu0 %vm238_vm3, %v237_v35 }
 0x12c   : > { %v258_v37 = vpop.f32.mrf.mxu0 }
 0x12d   : > { %v261_v38 = vmax.f32 %v258_v37, 0.0 }
 0x12f   : > { %446 = vmatmul.msk.f32.vlgmr.msra.gmra.mxu1 %vm263_vm4, %v261_v38 }
 0x1ac   : > { %v284_v42 = vpop.f32.mrf.mxu1 }
 0x1ad   : > { %v447_v43 = vmul.f32 -1.442695, %v284_v42 }
 0x1af   : > { %510 = vpow2.f32 %v447_v43 }
 0x1b5   : > { %v511_v44 = vpop.eup %510 }
 0x1b6   : > { %v290_v45 = vadd.f32 1.0, %v511_v44 }
 0x1b8   : > { %512 = vrcp.f32 %v290_v45  ;;  %v302_v49 = vand.u32 2147483648, %v290_v45  ;;  %v300_v51 = vand.u32 2147483647, %v290_v45  ;;  %vm296_vm6 = vweird.f32 %v290_v45 }
 0x1ba   : > { %v303_v53 = vor.u32 1.1754944e-38, %v302_v49  ;;  %vm301_vm8 = vcmp.eq.f32.partialorder %v300_v51, 8.507059e+37 }
 0x1be   : > { %v513_v46 = vpop.eup %512 }
 0x1bf   : > { %v292_v47 = vmul.f32 %v513_v46, %v290_v45  ;;  %vm297_vm5 = vweird.f32 %v513_v46 }
 0x1c0   : > { %vm298_vm7 = vmor %vm296_vm6, %vm297_vm5 }
 0x1c1   : > { %v293_v48 = vsub.f32 1.0, %v292_v47 }
 0x1c3   : > { %v294_v50 = vmul.f32 %v513_v46, %v293_v48 }
 0x1c5   : > { %v295_v52 = vadd.f32 %v513_v46, %v294_v50 }
 0x1c7   : > { %v299_v54 = vsel %vm298_vm7, %v513_v46, %v295_v52 }
 0x1c8   : > { %v304_v55 = vsel %vm301_vm8, %v303_v53, %v299_v54 }
 0x1c9   : > { %v306_v56 = vperm.slane %v304_v55, 0 }
 0x1cb   : > { %329 = vperm.xlu1 %508, %v306_v56   ;;  %323 = vperm.xlu0 %507, %v306_v56  }
 0x1cc   : > { %311 = vperm.xlu2 %505, %v306_v56  }
 0x1d3   : > { %509 = vset.pattern.permute.xlu0 %v327_v40 }
 0x1d4   : > { %506 = vset.pattern.permute.xlu2 %v315_v57 }
 0x1dc   : > { %317 = vperm.xlu2 %506, %v306_v56  }
 0x226   : > { %v312_v58 = vpop.permute.xlu2 %311 }
 0x227   : > { %v331_v59 = vmul.f32 %v312_v58, %v731_v0  ;;  %v332_v60 = vmul.f32 %v312_v58, %v733_v1 }
 0x229   : > { %339 = vst [vmem:[%s190_s22] sm:$0xff] %v331_v59 }
 0x22a   : > { %340 = vst [vmem:[%s190_s22 + $0x8] sm:$0xff] %v332_v60 }
 0x236   : > { %v318_v61 = vpop.permute.xlu2 %317 }
 0x237   : > { %v333_v62 = vmul.f32 %v318_v61, %v743_v6  ;;  %v334_v63 = vmul.f32 %v318_v61, %v745_v7 }
 0x239   : > { %341 = vst [vmem:[%s190_s22 + $0x10] sm:$0xff] %v333_v62 }
 0x23a   : > { %342 = vst [vmem:[%s190_s22 + $0x18] sm:$0xff] %v334_v63 }
 0x23d   : > { %v330_v0 = vpop.permute.xlu1 %329  ;;  %v324_v1 = vpop.permute.xlu0 %323 }
 0x23e   : > { %v337_v3 = vmul.f32 %v330_v0, %v747_v8  ;;  %v338_v5 = vmul.f32 %v330_v0, %v749_v9  ;;  %v335_v6 = vmul.f32 %v324_v1, %v735_v2  ;;  %v336_v7 = vmul.f32 %v324_v1, %v739_v4 }
 0x240   : > { %345 = vst [vmem:[%s190_s22 + $0x30] sm:$0xff] %v337_v3 }
 0x241   : > { %346 = vst [vmem:[%s190_s22 + $0x38] sm:$0xff] %v338_v5 }
 0x242   : > { %343 = vst [vmem:[%s190_s22 + $0x20] sm:$0xff] %v335_v6 }
 0x243   : > { %344 = vst [vmem:[%s190_s22 + $0x28] sm:$0xff] %v336_v7 }
 0x244   : > { %571 = shalt.err (!%p568_p4)
}
 0x245   : > { %s614_s29 = smov 256   ;;  %s615_s17 = smov 16  }
 0x246   : > { %457 = dma.vmem_to_hbm [thread:$0]  (%p685_p10), %s361_s6, 1024, %s363_s23, %s348_s16, %s614_s29, %s614_s29, %s615_s17  }
 0x247 PF: > { %p468_p5 = scmp.ge.s32.totalorder %s610_s15, 2  ;;  %s377_s19 = sand.u32 1, %s598_s12  }
 0x248   : > { %s378_s20 = scalar_lea.sflag [#allocation4], %s377_s19 }
 0x249   : > { %p464_p7 = pnand %p468_p5, %p689_p11 }
 0x24b   : > { %p465_p8 = pneg %p464_p7 }
 0x24d   : > { %593 = dma.done.wait (%p465_p8), %s378_s20, 1024  }
 0x24e   : > { %595 = vsyncadd (%p465_p8), %s378_s20, 4294966272  ;;  %p16_p9 = scmp.ge.s32.totalorder %s661_s18, 6   ;;  %s821_s12 = smov %s602_s13 }
 0x24f   : > { %s822_s13 = smov %s606_s14  ;;  %s823_s14 = smov %s673_s21 }
 0x250   : > { %s824_s15 = smov %s661_s18  ;;  %18 = sbr.rel (!%p16_p9) target bundleno = 5 (0x5), region = 77 }
 0x255   :  { %384 = vsyncpa [#allocation3], 1 }
 0x256   :  { %386 = vsyncpa [#allocation3 + $0x1], 1 }
 0x257   :  { %387 = vsyncpa [#allocation4], 1 }
 0x258   :  { %389 = vsyncpa [#allocation4 + $0x1], 1 }

</bundles_post_ra>
